<compile_context>
chip_gen: v7x
topology: tpu7x:2x2x1
jax: 0.10.0
libtpu: 0.0.40
codegen_flags: <defaults>
</compile_context>

<pallas_src>
import jax
import jax.numpy as jnp
from jax.experimental import pallas as pl
from jax.experimental.pallas import tpu as pltpu


def _identity_kernel(x_ref, o_ref):
    # Pure pass-through: load the VMEM tile and store it to the output tile.
    # Subclasses of BaseAgent would replace this body with real compute.
    o_ref[...] = x_ref[...]


# Lane-dense candidates for the last (lane) dimension; all multiples of 128.
_LANE_CANDIDATES = (8192, 4096, 2048, 1024, 512, 256, 128)


def _hw_params():
    """Generation-aware (target_tile_bytes, vmem_limit_bytes_or_None)."""
    try:
        vmem_cap = int(pltpu.get_tpu_info().vmem_capacity_bytes)
    except Exception:  # conservative fallback if the query is unavailable
        vmem_cap = 64 * 1024 * 1024
    if vmem_cap >= 100 * 1024 * 1024:
        # v5e / v6e (128 MiB VMEM): bigger tiles amortize the ~0.35 us
        # per-grid-step overhead; 2 in + 2 out double-buffered 8 MiB tiles
        # (32 MiB) need the scoped-VMEM limit raised.
        return 8 * 1024 * 1024, 48 * 1024 * 1024
    # v7x (64 MiB VMEM): 4 MiB tiles => 16 MiB of buffers fits the default
    # 32 MiB scoped budget, so no override and plenty of headroom left for
    # any scratch a subclass adds on top of this template.
    return 4 * 1024 * 1024, None


def _choose_layout(total: int, itemsize: int, target_tile_bytes: int):
    """Pick a lane-dense (rows, cols) slab, a row tile, and padding."""
    # Sublanes per 32-bit vreg row-group: 8 for f32, 16 for bf16, 32 for int8.
    packing = max(8, 32 // itemsize)

    # Prefer a split that is lane-dense (cols % 128 == 0) AND sublane-dense
    # (rows >= packing) so every vreg is fully populated.
    cols = next((c for c in _LANE_CANDIDATES
                 if total % c == 0 and total // c >= packing), None)
    if cols is None:
        cols = next((c for c in _LANE_CANDIDATES if total % c == 0), None)

    pad = 0
    if cols is None:
        # Awkward (e.g. prime) element count: pad the flat view up to a
        # lane+sublane dense multiple instead of emitting one unbounded
        # (1, total) block that could exceed the VMEM budget.
        cols = 512
        chunk = packing * cols
        pad = (-total) % chunk

    rows = (total + pad) // cols

    tr = (target_tile_bytes // (cols * itemsize)) // packing * packing
    tr = max(packing, tr)
    if tr >= rows:
        # Whole array fits in one tile.  If it is still sizeable, split into
        # two grid steps so the "parallel" axis can shard across v7x's two
        # TensorCores; otherwise use a single full-extent block.
        if rows >= 2 * packing and rows * cols * itemsize >= 2 * 1024 * 1024:
            tr = max(packing, (rows // 2) // packing * packing)
        else:
            tr = rows
    return rows, cols, tr, pad


def base_agent_forward(x: jax.Array, *, use_kernel: bool = False) -> jax.Array:
    """Forward pass of BaseAgent (identity).

    BaseAgent.forward is abstract in PyTorch (raises ValueError); the only
    defined semantics of the parameterless base module is identity.  The
    default path therefore returns `x` directly — launching a copy kernel
    would cost 2x array-bytes of HBM traffic for zero compute.  Passing
    `use_kernel=True` runs the lane-dense tiled Pallas template that
    subclasses are meant to fill with real compute.
    """
    # TODO(synk): BaseAgent.forward/sample/train_agent are abstract (raise
    #             ValueError); real compute lives only in subclasses, so only
    #             an identity pass-through / copy-kernel template is emitted.
    if not use_kernel:
        return x

    orig_shape = x.shape
    total = x.size
    itemsize = jnp.dtype(x.dtype).itemsize

    target_tile_bytes, vmem_limit = _hw_params()
    rows, cols, tr, pad = _choose_layout(total, itemsize, target_tile_bytes)

    flat = x.reshape(-1)
    if pad:
        flat = jnp.pad(flat, (0, pad))
    x2d = flat.reshape(rows, cols)

    out2d = pl.pallas_call(
        _identity_kernel,
        out_shape=jax.ShapeDtypeStruct((rows, cols), x.dtype),
        grid_spec=pltpu.PrefetchScalarGridSpec(
            num_scalar_prefetch=0,
            grid=(pl.cdiv(rows, tr),),
            in_specs=[pl.BlockSpec((tr, cols), lambda i: (i, 0))],
            out_specs=pl.BlockSpec((tr, cols), lambda i: (i, 0)),
        ),
        # NOTE: no input_output_aliases — without caller-side donation it only
        # inserts a protective copy, and with donation the caller could no
        # longer read x after the call.
        compiler_params=pltpu.CompilerParams(
            dimension_semantics=("parallel",),
            vmem_limit_bytes=vmem_limit,
        ),
    )(x2d)

    out_flat = out2d.reshape(-1)
    if pad:
        out_flat = out_flat[:total]
    return out_flat.reshape(orig_shape)


if __name__ == "__main__":
    key = jax.random.PRNGKey(0)
    # Small NCHW input consistent with a generic agent forward.
    x = jax.random.normal(key, (2, 4, 16, 16), dtype=jnp.float32)

    # 1) Default path: abstract identity forward short-circuits (no kernel).
    y_fast = base_agent_forward(x)
    jax.block_until_ready(y_fast)
    assert y_fast.shape == x.shape and y_fast.dtype == x.dtype
    assert bool(jnp.allclose(y_fast, x))

    # 2) Opt-in subclass-template kernel path (lane/sublane-dense tiling).
    y = base_agent_forward(x, use_kernel=True)
    jax.block_until_ready(y)
    assert y.shape == x.shape and y.dtype == x.dtype
    assert bool(jnp.allclose(y, x))

    # 3) Awkward element count exercises the padded fallback path.
    x_odd = jax.random.normal(key, (1155,), dtype=jnp.float32)
    y_odd = base_agent_forward(x_odd, use_kernel=True)
    jax.block_until_ready(y_odd)
    assert y_odd.shape == x_odd.shape and y_odd.dtype == x_odd.dtype
    assert bool(jnp.allclose(y_odd, x_odd))

    print("KERNEL_OK")
</pallas_src>

<mosaic_0001>
module attributes {stable_mosaic.version = 11 : i64} {
  func.func @_identity_kernel(%arg0: i32, %arg1: memref<8x256xf32, #tpu.memory_space<vmem>>, %arg2: memref<8x256xf32, #tpu.memory_space<vmem>>) attributes {dimension_semantics = [#tpu.dimension_semantics<parallel>], iteration_bounds = array<i64: 1>, scalar_prefetch = 0 : i64, scratch_operands = 0 : i64, tpu.core_type = #tpu.core_type<tc>, window_params = [{transform_indices = @transform_0, window_bounds = array<i64: 8, 256>}, {transform_indices = @transform_1, window_bounds = array<i64: 8, 256>}]} {
    %c0 = arith.constant 0 : index
    %c0_0 = arith.constant 0 : index
    %0 = vector.load %arg1[%c0, %c0_0] : memref<8x256xf32, #tpu.memory_space<vmem>>, vector<8x256xf32>
    %c0_1 = arith.constant 0 : index
    %c0_2 = arith.constant 0 : index
    %1 = vector.load %arg2[%c0_1, %c0_2] : memref<8x256xf32, #tpu.memory_space<vmem>>, vector<8x256xf32>
    tpu.vector_store %arg2[%c0_1, %c0_2], %0 {strides = array<i32>} : memref<8x256xf32, #tpu.memory_space<vmem>>, vector<8x256xf32>,
    return
  }
  func.func @transform_0(%arg0: i32) -> (i32, i32) {
    %c0_i32 = arith.constant 0 : i32
    %c0_i32_0 = arith.constant 0 : i32
    return %arg0, %c0_i32 : i32, i32
  }
  func.func @transform_1(%arg0: i32) -> (i32, i32) {
    %c0_i32 = arith.constant 0 : i32
    %c0_i32_0 = arith.constant 0 : i32
    return %arg0, %c0_i32 : i32, i32
  }
}

</mosaic_0001>

<bundles_post_ra>
// kernel: tpu_custom_call.1
= control target key start
LH: loop header
LB: loop body
LE: loop exit
PB: predicated region body
PF: predicated region fallthrough
CT: control target
= control target key end

     0   :  { %6 = vsyncpa [#allocation3], 0  ;;  %s126_s0 = inlined_call_operand.hbm [shape: f32[8,256], index: 0, kind: input, shape index: {}]   ;;  %s127_s1 = inlined_call_operand.hbm [shape: f32[8,256], index: 1, kind: output, shape index: {}]  }
   0x1   :  { %7 = vsyncpa [#allocation4], 0  ;;  %s90_s6 = smov [#allocation2]   ;;  %s42_s10 = scalar_lea.hbm %s126_s0, 256 }
   0x2   :  { %s14_s7 = sshll.u32 %s90_s6, 4  ;;  %p43_p0 = scmp.ne.s32.totalorder %s126_s0, %s42_s10  ;;  %s15_s7 = int_to_ptr.vmem [resolvable:$true] %s14_s7 }
   0x3   :  { %p46_p1 = scmp.lt.u32.totalorder %s42_s10, %s126_s0 }
   0x5   :  { %p48_p2 = pnand %p46_p1, %p43_p0 }
   0x7   :  { %51 = shalt.err (!%p48_p2)
}
   0x8   :  { %s52_s15 = scalar_lea.vmem %s15_s7, 256  ;;  %p57_p4 = scmp.lt.s32.totalorder %s15_s7, %s15_s7 }
   0x9   :  { %p53_p3 = scmp.ne.s32.totalorder %s15_s7, %s52_s15  ;;  %p58_p5 = scmp.lt.s32.totalorder %s52_s15, %s52_s15 }
   0xb   :  { %p59_p6 = por %p58_p5, %p57_p4 }
   0xd   :  { %p60_p7 = pnand %p59_p6, %p53_p3 }
   0xf   :  { %63 = shalt.err (!%p60_p7)
}
  0x10   :  { %17 = dma.hbm_to_vmem [thread:$0]  %s126_s0, 256, %s15_s7, [#allocation3]  }
  0x11   :  { %86 = dma.done.wait [#allocation3], 256  }
  0x12   :  { %87 = vsyncadd [#allocation3], 4294967040  ;;  %s91_s18 = smov [#allocation5]   ;;  %v21_v0 = vld [vmem:[#allocation2] sm:$0xff]  ;;  %v22_v1 = vld [vmem:[#allocation2 + $0x8] sm:$0xff] }
  0x13   :  { %s31_s19 = sshll.u32 %s91_s18, 4  ;;  %23 = vst [vmem:[#allocation5] sm:$0xff] %v21_v0  ;;  %24 = vst [vmem:[#allocation5 + $0x8] sm:$0xff] %v22_v1  ;;  %s32_s19 = int_to_ptr.vmem [resolvable:$true] %s31_s19 }
  0x14   :  { %s64_s20 = scalar_lea.vmem %s32_s19, 256  ;;  %p69_p9 = scmp.lt.s32.totalorder %s32_s19, %s32_s19 }
  0x15   :  { %p65_p8 = scmp.ne.s32.totalorder %s32_s19, %s64_s20  ;;  %p70_p10 = scmp.lt.s32.totalorder %s64_s20, %s64_s20 }
  0x17   :  { %p71_p11 = por %p70_p10, %p69_p9 }
  0x19   :  { %p72_p12 = pnand %p71_p11, %p65_p8 }
  0x1b   :  { %75 = shalt.err (!%p72_p12)
}
  0x1c   :  { %s76_s0 = scalar_lea.hbm %s127_s1, 256 }
  0x1d   :  { %p77_p13 = scmp.ne.s32.totalorder %s127_s1, %s76_s0  ;;  %p80_p0 = scmp.lt.u32.totalorder %s76_s0, %s127_s1 }
  0x1f   :  { %p82_p1 = pnand %p80_p0, %p77_p13 }
  0x21   :  { %85 = shalt.err (!%p82_p1)
}
  0x22   :  { %34 = dma.vmem_to_hbm [thread:$0]  %s32_s19, 256, %s127_s1, [#allocation4]  }
  0x23   :  { %88 = dma.done.wait [#allocation4], 256  }
  0x24   :  { %89 = vsyncadd [#allocation4], 4294967040 }
  0x25   :  { %38 = vsyncpa [#allocation3], 1 }
  0x26   :  { %39 = vsyncpa [#allocation4], 1 }

</bundles_post_ra>
